<compile_context>
chip_gen: v5e
topology: v5e:2x2
jax: 0.10.0
libtpu: 0.0.40
codegen_flags: <defaults>
</compile_context>

<pallas_src>
import jax
import jax.numpy as jnp
from jax.experimental import pallas as pl
from jax.experimental.pallas import tpu as pltpu

# ---- problem sizes (small, consistent with the module: 3 heads, head_dim 16) ----
BATCH = 2
SEQ = 8
NUM_HEADS = 3
HEAD_DIM = 16
HIDDEN = NUM_HEADS * HEAD_DIM  # 48
LN_EPS = 1e-5                  # PyTorch nn.LayerNorm default eps

_HIGHEST = jax.lax.Precision.HIGHEST


def attn_ln_kernel(q_ref, k_ref, v_ref, gb_ref, o_ref, ctx_ref):
    # q_ref / k_ref / v_ref / o_ref : (B, S, HIDDEN) VMEM blocks (full arrays).
    # gb_ref                        : (2, 1, HIDDEN) -- row 0 = gamma, row 1 = beta.
    # ctx_ref                       : (B, S, HIDDEN) f32 VMEM scratch (merged context).

    # ---- attention, one head at a time (static lane slices), batched over B ----
    for h in range(NUM_HEADS):                          # static unroll, 3 heads
        lo = h * HEAD_DIM
        qh = q_ref[:, :, lo:lo + HEAD_DIM].astype(jnp.float32)   # (B, S, Dh)
        kh = k_ref[:, :, lo:lo + HEAD_DIM].astype(jnp.float32)
        vh = v_ref[:, :, lo:lo + HEAD_DIM].astype(jnp.float32)

        # NO 1/sqrt(d) scaling -- matches the PyTorch module exactly.
        s = jnp.einsum("bsd,btd->bst", qh, kh,
                       preferred_element_type=jnp.float32,
                       precision=_HIGHEST)                        # (B, S, S)
        # Numerically-stable softmax over the key axis; exact divide (no approx).
        s = s - jnp.max(s, axis=-1, keepdims=True)
        p = jnp.exp(s)
        p = p / jnp.sum(p, axis=-1, keepdims=True)

        ctx_h = jnp.einsum("bst,btd->bsd", p, vh,
                           preferred_element_type=jnp.float32,
                           precision=_HIGHEST)                    # (B, S, Dh)

        # Head merge = static lane-slice store into the (B, S, HIDDEN) scratch.
        ctx_ref[:, :, lo:lo + HEAD_DIM] = ctx_h

    # ---- LayerNorm over the hidden (lane) axis ----
    ctx = ctx_ref[...]                                            # (B, S, H)
    mean = jnp.mean(ctx, axis=-1, keepdims=True)
    centered = ctx - mean
    var = jnp.mean(centered * centered, axis=-1, keepdims=True)
    normed = centered * jax.lax.rsqrt(var + LN_EPS)

    gb = gb_ref[...]                                              # (2, 1, H)
    gamma = gb[0]                                                 # (1, H)
    beta = gb[1]                                                  # (1, H)
    # Single lane-dense (B, S, 48) store.
    o_ref[...] = (normed * gamma + beta).astype(o_ref.dtype)


def self_attention(q, k, v, gamma, beta):
    """q, k, v: (B, S, HIDDEN) float32.  gamma/beta: (HIDDEN,) LayerNorm params."""
    B, S, H = q.shape
    assert (B, S, H) == (BATCH, SEQ, HIDDEN)

    # Pack gamma/beta into one array -> one DMA / one BlockSpec.
    gb = jnp.stack([gamma, beta]).reshape(2, 1, H)

    flops = 4 * B * NUM_HEADS * S * S * HEAD_DIM + 8 * B * S * H   # ~25k matmul + LN
    transcendentals = B * NUM_HEADS * S * S + B * S                # exp + rsqrt
    bytes_accessed = (3 * B * S * H + 2 * H + B * S * H) * 4       # ~13 KiB

    return pl.pallas_call(
        attn_ln_kernel,
        out_shape=jax.ShapeDtypeStruct((B, S, H), q.dtype),
        grid_spec=pltpu.PrefetchScalarGridSpec(
            num_scalar_prefetch=0,
            grid=(1,),   # whole problem in one invocation (launch/overhead bound)
            in_specs=[
                pl.BlockSpec((B, S, H), lambda i: (0, 0, 0)),
                pl.BlockSpec((B, S, H), lambda i: (0, 0, 0)),
                pl.BlockSpec((B, S, H), lambda i: (0, 0, 0)),
                pl.BlockSpec((2, 1, H), lambda i: (0, 0, 0)),
            ],
            out_specs=pl.BlockSpec((B, S, H), lambda i: (0, 0, 0)),
            scratch_shapes=[pltpu.VMEM((B, S, H), jnp.float32)],
        ),
        compiler_params=pltpu.CompilerParams(
            dimension_semantics=("arbitrary",)),
        cost_estimate=pl.CostEstimate(
            flops=flops,
            transcendentals=transcendentals,
            bytes_accessed=bytes_accessed),
    )(q, k, v, gb)


def reference(q, k, v, gamma, beta):
    """Pure-JAX reference mirroring the PyTorch forward (HIGHEST matmul precision)."""
    B, S, H = q.shape

    def split(x):  # (B, S, H) -> (B, heads, S, Dh)
        return x.reshape(B, S, NUM_HEADS, HEAD_DIM).transpose(0, 2, 1, 3)

    qh, kh, vh = split(q), split(k), split(v)
    scores = jnp.einsum("bhqd,bhkd->bhqk", qh, kh, precision=_HIGHEST)  # no 1/sqrt(d)
    probs = jax.nn.softmax(scores, axis=-1)
    ctx = jnp.einsum("bhqk,bhkd->bhqd", probs, vh, precision=_HIGHEST)
    ctx = ctx.transpose(0, 2, 1, 3).reshape(B, S, H)
    mean = ctx.mean(-1, keepdims=True)
    var = ((ctx - mean) ** 2).mean(-1, keepdims=True)
    return (ctx - mean) / jnp.sqrt(var + LN_EPS) * gamma + beta


if __name__ == "__main__":
    key = jax.random.PRNGKey(0)
    kq, kk, kv = jax.random.split(key, 3)
    q = jax.random.normal(kq, (BATCH, SEQ, HIDDEN), dtype=jnp.float32)
    k = jax.random.normal(kk, (BATCH, SEQ, HIDDEN), dtype=jnp.float32)
    v = jax.random.normal(kv, (BATCH, SEQ, HIDDEN), dtype=jnp.float32)

    # LayerNorm params, deterministic PyTorch-default init (ones / zeros).
    gamma = jnp.ones((HIDDEN,), dtype=jnp.float32)
    beta = jnp.zeros((HIDDEN,), dtype=jnp.float32)

    out = jax.block_until_ready(self_attention(q, k, v, gamma, beta))
    ref = reference(q, k, v, gamma, beta)

    assert out.shape == (BATCH, SEQ, HIDDEN)
    # Exact softmax divide + matched f32 matmul precision -> differences are only
    # reduction-order / few-ulp transcendental noise; 1e-4 leaves ample margin
    # while still catching any structural error (those are O(0.1..1)).
    assert jnp.allclose(out, ref, atol=1e-4, rtol=1e-4), (
        "mismatch vs reference: max abs err = "
        f"{float(jnp.max(jnp.abs(out - ref))):.3e}")

    print("KERNEL_OK")
</pallas_src>

<mosaic_0001>
module attributes {stable_mosaic.version = 11 : i64} {
  func.func @attn_ln_kernel(%arg0: i32, %arg1: memref<2x8x48xf32, #tpu.memory_space<vmem>>, %arg2: memref<2x8x48xf32, #tpu.memory_space<vmem>>, %arg3: memref<2x8x48xf32, #tpu.memory_space<vmem>>, %arg4: memref<2x1x48xf32, #tpu.memory_space<vmem>>, %arg5: memref<2x8x48xf32, #tpu.memory_space<vmem>>, %arg6: memref<2x8x48xf32, #tpu.memory_space<vmem>>) attributes {dimension_semantics = [#tpu.dimension_semantics<arbitrary>], iteration_bounds = array<i64: 1>, scalar_prefetch = 0 : i64, scratch_operands = 1 : i64, tpu.core_type = #tpu.core_type<tc>, window_params = [{pipeline_mode = #tpu.pipeline_mode<synchronous>, transform_indices = @transform_0, window_bounds = array<i64: 2, 8, 48>}, {pipeline_mode = #tpu.pipeline_mode<synchronous>, transform_indices = @transform_1, window_bounds = array<i64: 2, 8, 48>}, {pipeline_mode = #tpu.pipeline_mode<synchronous>, transform_indices = @transform_2, window_bounds = array<i64: 2, 8, 48>}, {pipeline_mode = #tpu.pipeline_mode<synchronous>, transform_indices = @transform_3, window_bounds = array<i64: 2, 1, 48>}, {pipeline_mode = #tpu.pipeline_mode<synchronous>, transform_indices = @transform_4, window_bounds = array<i64: 2, 8, 48>}]} {
    %c0 = arith.constant 0 : index
    %c0_0 = arith.constant 0 : index
    %c0_1 = arith.constant 0 : index
    %0 = vector.load %arg1[%c0, %c0_0, %c0_1] : memref<2x8x48xf32, #tpu.memory_space<vmem>>, vector<2x8x16xf32>
    %c0_2 = arith.constant 0 : index
    %c0_3 = arith.constant 0 : index
    %c0_4 = arith.constant 0 : index
    %1 = vector.load %arg2[%c0_2, %c0_3, %c0_4] : memref<2x8x48xf32, #tpu.memory_space<vmem>>, vector<2x8x16xf32>
    %c0_5 = arith.constant 0 : index
    %c0_6 = arith.constant 0 : index
    %c0_7 = arith.constant 0 : index
    %2 = vector.load %arg3[%c0_5, %c0_6, %c0_7] : memref<2x8x48xf32, #tpu.memory_space<vmem>>, vector<2x8x16xf32>
    "tpu.trace_start"() <{level = 10 : i32, message = "bsd,btd->bst"}> : () -> ()
    %cst = arith.constant dense<0.000000e+00> : vector<2x8x8xf32>
    %3 = tpu.matmul %0, %1, %cst {dimension_numbers = #tpu.dot_dimension_numbers<[2], [2], [1], [1], [0, 0, 0, 1, 1, 1], [0], [0]>, precision = #tpu.contract_precision<fp32>} : vector<2x8x16xf32>, vector<2x8x16xf32>, vector<2x8x8xf32> -> vector<2x8x8xf32>
    "tpu.trace_stop"() : () -> ()
    %cst_8 = arith.constant dense<0xFF800000> : vector<2x8xf32>
    %4 = vector.multi_reduction <maximumf>, %3, %cst_8 [2] : vector<2x8x8xf32> to vector<2x8xf32>
    %5 = vector.shape_cast %4 : vector<2x8xf32> to vector<2x8x1xf32>
    %6 = vector.broadcast %5 : vector<2x8x1xf32> to vector<2x8x8xf32>
    %7 = arith.subf %3, %6 : vector<2x8x8xf32>
    %8 = math.exp %7 : vector<2x8x8xf32>
    %cst_9 = arith.constant dense<0.000000e+00> : vector<2x8xf32>
    %9 = vector.multi_reduction <add>, %8, %cst_9 [2] : vector<2x8x8xf32> to vector<2x8xf32>
    %10 = vector.shape_cast %9 : vector<2x8xf32> to vector<2x8x1xf32>
    %11 = vector.broadcast %10 : vector<2x8x1xf32> to vector<2x8x8xf32>
    %12 = arith.divf %8, %11 : vector<2x8x8xf32>
    "tpu.trace_start"() <{level = 10 : i32, message = "bst,btd->bsd"}> : () -> ()
    %cst_10 = arith.constant dense<0.000000e+00> : vector<2x8x16xf32>
    %13 = tpu.matmul %12, %2, %cst_10 {dimension_numbers = #tpu.dot_dimension_numbers<[2], [1], [1], [2], [0, 0, 0, 1, 1, 2], [0], [0]>, precision = #tpu.contract_precision<fp32>} : vector<2x8x8xf32>, vector<2x8x16xf32>, vector<2x8x16xf32> -> vector<2x8x16xf32>
    "tpu.trace_stop"() : () -> ()
    %c0_11 = arith.constant 0 : index
    %c0_12 = arith.constant 0 : index
    %c0_13 = arith.constant 0 : index
    %14 = vector.load %arg6[%c0_11, %c0_12, %c0_13] : memref<2x8x48xf32, #tpu.memory_space<vmem>>, vector<2x8x16xf32>
    tpu.vector_store %arg6[%c0_11, %c0_12, %c0_13], %13 {strides = array<i32>} : memref<2x8x48xf32, #tpu.memory_space<vmem>>, vector<2x8x16xf32>,
    %c0_14 = arith.constant 0 : index
    %c0_15 = arith.constant 0 : index
    %c16 = arith.constant 16 : index
    %15 = vector.load %arg1[%c0_14, %c0_15, %c16] : memref<2x8x48xf32, #tpu.memory_space<vmem>>, vector<2x8x16xf32>
    %c0_16 = arith.constant 0 : index
    %c0_17 = arith.constant 0 : index
    %c16_18 = arith.constant 16 : index
    %16 = vector.load %arg2[%c0_16, %c0_17, %c16_18] : memref<2x8x48xf32, #tpu.memory_space<vmem>>, vector<2x8x16xf32>
    %c0_19 = arith.constant 0 : index
    %c0_20 = arith.constant 0 : index
    %c16_21 = arith.constant 16 : index
    %17 = vector.load %arg3[%c0_19, %c0_20, %c16_21] : memref<2x8x48xf32, #tpu.memory_space<vmem>>, vector<2x8x16xf32>
    "tpu.trace_start"() <{level = 10 : i32, message = "bsd,btd->bst"}> : () -> ()
    %cst_22 = arith.constant dense<0.000000e+00> : vector<2x8x8xf32>
    %18 = tpu.matmul %15, %16, %cst_22 {dimension_numbers = #tpu.dot_dimension_numbers<[2], [2], [1], [1], [0, 0, 0, 1, 1, 1], [0], [0]>, precision = #tpu.contract_precision<fp32>} : vector<2x8x16xf32>, vector<2x8x16xf32>, vector<2x8x8xf32> -> vector<2x8x8xf32>
    "tpu.trace_stop"() : () -> ()
    %cst_23 = arith.constant dense<0xFF800000> : vector<2x8xf32>
    %19 = vector.multi_reduction <maximumf>, %18, %cst_23 [2] : vector<2x8x8xf32> to vector<2x8xf32>
    %20 = vector.shape_cast %19 : vector<2x8xf32> to vector<2x8x1xf32>
    %21 = vector.broadcast %20 : vector<2x8x1xf32> to vector<2x8x8xf32>
    %22 = arith.subf %18, %21 : vector<2x8x8xf32>
    %23 = math.exp %22 : vector<2x8x8xf32>
    %cst_24 = arith.constant dense<0.000000e+00> : vector<2x8xf32>
    %24 = vector.multi_reduction <add>, %23, %cst_24 [2] : vector<2x8x8xf32> to vector<2x8xf32>
    %25 = vector.shape_cast %24 : vector<2x8xf32> to vector<2x8x1xf32>
    %26 = vector.broadcast %25 : vector<2x8x1xf32> to vector<2x8x8xf32>
    %27 = arith.divf %23, %26 : vector<2x8x8xf32>
    "tpu.trace_start"() <{level = 10 : i32, message = "bst,btd->bsd"}> : () -> ()
    %cst_25 = arith.constant dense<0.000000e+00> : vector<2x8x16xf32>
    %28 = tpu.matmul %27, %17, %cst_25 {dimension_numbers = #tpu.dot_dimension_numbers<[2], [1], [1], [2], [0, 0, 0, 1, 1, 2], [0], [0]>, precision = #tpu.contract_precision<fp32>} : vector<2x8x8xf32>, vector<2x8x16xf32>, vector<2x8x16xf32> -> vector<2x8x16xf32>
    "tpu.trace_stop"() : () -> ()
    %c0_26 = arith.constant 0 : index
    %c0_27 = arith.constant 0 : index
    %c16_28 = arith.constant 16 : index
    %29 = vector.load %arg6[%c0_26, %c0_27, %c16_28] : memref<2x8x48xf32, #tpu.memory_space<vmem>>, vector<2x8x16xf32>
    tpu.vector_store %arg6[%c0_26, %c0_27, %c16_28], %28 {strides = array<i32>} : memref<2x8x48xf32, #tpu.memory_space<vmem>>, vector<2x8x16xf32>,
    %c0_29 = arith.constant 0 : index
    %c0_30 = arith.constant 0 : index
    %c32 = arith.constant 32 : index
    %30 = vector.load %arg1[%c0_29, %c0_30, %c32] : memref<2x8x48xf32, #tpu.memory_space<vmem>>, vector<2x8x16xf32>
    %c0_31 = arith.constant 0 : index
    %c0_32 = arith.constant 0 : index
    %c32_33 = arith.constant 32 : index
    %31 = vector.load %arg2[%c0_31, %c0_32, %c32_33] : memref<2x8x48xf32, #tpu.memory_space<vmem>>, vector<2x8x16xf32>
    %c0_34 = arith.constant 0 : index
    %c0_35 = arith.constant 0 : index
    %c32_36 = arith.constant 32 : index
    %32 = vector.load %arg3[%c0_34, %c0_35, %c32_36] : memref<2x8x48xf32, #tpu.memory_space<vmem>>, vector<2x8x16xf32>
    "tpu.trace_start"() <{level = 10 : i32, message = "bsd,btd->bst"}> : () -> ()
    %cst_37 = arith.constant dense<0.000000e+00> : vector<2x8x8xf32>
    %33 = tpu.matmul %30, %31, %cst_37 {dimension_numbers = #tpu.dot_dimension_numbers<[2], [2], [1], [1], [0, 0, 0, 1, 1, 1], [0], [0]>, precision = #tpu.contract_precision<fp32>} : vector<2x8x16xf32>, vector<2x8x16xf32>, vector<2x8x8xf32> -> vector<2x8x8xf32>
    "tpu.trace_stop"() : () -> ()
    %cst_38 = arith.constant dense<0xFF800000> : vector<2x8xf32>
    %34 = vector.multi_reduction <maximumf>, %33, %cst_38 [2] : vector<2x8x8xf32> to vector<2x8xf32>
    %35 = vector.shape_cast %34 : vector<2x8xf32> to vector<2x8x1xf32>
    %36 = vector.broadcast %35 : vector<2x8x1xf32> to vector<2x8x8xf32>
    %37 = arith.subf %33, %36 : vector<2x8x8xf32>
    %38 = math.exp %37 : vector<2x8x8xf32>
    %cst_39 = arith.constant dense<0.000000e+00> : vector<2x8xf32>
    %39 = vector.multi_reduction <add>, %38, %cst_39 [2] : vector<2x8x8xf32> to vector<2x8xf32>
    %40 = vector.shape_cast %39 : vector<2x8xf32> to vector<2x8x1xf32>
    %41 = vector.broadcast %40 : vector<2x8x1xf32> to vector<2x8x8xf32>
    %42 = arith.divf %38, %41 : vector<2x8x8xf32>
    "tpu.trace_start"() <{level = 10 : i32, message = "bst,btd->bsd"}> : () -> ()
    %cst_40 = arith.constant dense<0.000000e+00> : vector<2x8x16xf32>
    %43 = tpu.matmul %42, %32, %cst_40 {dimension_numbers = #tpu.dot_dimension_numbers<[2], [1], [1], [2], [0, 0, 0, 1, 1, 2], [0], [0]>, precision = #tpu.contract_precision<fp32>} : vector<2x8x8xf32>, vector<2x8x16xf32>, vector<2x8x16xf32> -> vector<2x8x16xf32>
    "tpu.trace_stop"() : () -> ()
    %c0_41 = arith.constant 0 : index
    %c0_42 = arith.constant 0 : index
    %c32_43 = arith.constant 32 : index
    %44 = vector.load %arg6[%c0_41, %c0_42, %c32_43] : memref<2x8x48xf32, #tpu.memory_space<vmem>>, vector<2x8x16xf32>
    tpu.vector_store %arg6[%c0_41, %c0_42, %c32_43], %43 {strides = array<i32>} : memref<2x8x48xf32, #tpu.memory_space<vmem>>, vector<2x8x16xf32>,
    %c0_44 = arith.constant 0 : index
    %c0_45 = arith.constant 0 : index
    %c0_46 = arith.constant 0 : index
    %45 = vector.load %arg6[%c0_44, %c0_45, %c0_46] : memref<2x8x48xf32, #tpu.memory_space<vmem>>, vector<2x8x48xf32>
    %cst_47 = arith.constant dense<0.000000e+00> : vector<2x8xf32>
    %46 = vector.multi_reduction <add>, %45, %cst_47 [2] : vector<2x8x48xf32> to vector<2x8xf32>
    %47 = vector.shape_cast %46 : vector<2x8xf32> to vector<2x8x1xf32>
    %cst_48 = arith.constant 4.800000e+01 : f32
    %48 = vector.broadcast %cst_48 : f32 to vector<2x8x1xf32>
    %49 = arith.divf %47, %48 : vector<2x8x1xf32>
    %50 = vector.broadcast %49 : vector<2x8x1xf32> to vector<2x8x48xf32>
    %51 = arith.subf %45, %50 : vector<2x8x48xf32>
    %52 = arith.mulf %51, %51 : vector<2x8x48xf32>
    %cst_49 = arith.constant dense<0.000000e+00> : vector<2x8xf32>
    %53 = vector.multi_reduction <add>, %52, %cst_49 [2] : vector<2x8x48xf32> to vector<2x8xf32>
    %54 = vector.shape_cast %53 : vector<2x8xf32> to vector<2x8x1xf32>
    %cst_50 = arith.constant 4.800000e+01 : f32
    %55 = vector.broadcast %cst_50 : f32 to vector<2x8x1xf32>
    %56 = arith.divf %54, %55 : vector<2x8x1xf32>
    %cst_51 = arith.constant 9.99999974E-6 : f32
    %57 = vector.broadcast %cst_51 : f32 to vector<2x8x1xf32>
    %58 = arith.addf %56, %57 : vector<2x8x1xf32>
    %59 = math.rsqrt %58 : vector<2x8x1xf32>
    %60 = vector.broadcast %59 : vector<2x8x1xf32> to vector<2x8x48xf32>
    %61 = arith.mulf %51, %60 : vector<2x8x48xf32>
    %c0_52 = arith.constant 0 : index
    %c0_53 = arith.constant 0 : index
    %c0_54 = arith.constant 0 : index
    %62 = vector.load %arg4[%c0_52, %c0_53, %c0_54] : memref<2x1x48xf32, #tpu.memory_space<vmem>>, vector<2x1x48xf32>
    %63 = vector.extract_strided_slice %62 {offsets = [0, 0, 0], sizes = [1, 1, 48], strides = [1, 1, 1]} : vector<2x1x48xf32> to vector<1x1x48xf32>
    %64 = vector.shape_cast %63 : vector<1x1x48xf32> to vector<1x48xf32>
    %65 = vector.extract_strided_slice %62 {offsets = [1, 0, 0], sizes = [1, 1, 48], strides = [1, 1, 1]} : vector<2x1x48xf32> to vector<1x1x48xf32>
    %66 = vector.shape_cast %65 : vector<1x1x48xf32> to vector<1x48xf32>
    %67 = vector.shape_cast %64 : vector<1x48xf32> to vector<1x1x48xf32>
    %68 = vector.broadcast %67 : vector<1x1x48xf32> to vector<2x8x48xf32>
    %69 = arith.mulf %61, %68 : vector<2x8x48xf32>
    %70 = vector.shape_cast %66 : vector<1x48xf32> to vector<1x1x48xf32>
    %71 = vector.broadcast %70 : vector<1x1x48xf32> to vector<2x8x48xf32>
    %72 = arith.addf %69, %71 : vector<2x8x48xf32>
    %c0_55 = arith.constant 0 : index
    %c0_56 = arith.constant 0 : index
    %c0_57 = arith.constant 0 : index
    %73 = vector.load %arg5[%c0_55, %c0_56, %c0_57] : memref<2x8x48xf32, #tpu.memory_space<vmem>>, vector<2x8x48xf32>
    tpu.vector_store %arg5[%c0_55, %c0_56, %c0_57], %72 {strides = array<i32>} : memref<2x8x48xf32, #tpu.memory_space<vmem>>, vector<2x8x48xf32>,
    return
  }
  func.func @transform_0(%arg0: i32) -> (i32, i32, i32) {
    %c0_i32 = arith.constant 0 : i32
    %c0_i32_0 = arith.constant 0 : i32
    %c0_i32_1 = arith.constant 0 : i32
    %c0_i32_2 = arith.constant 0 : i32
    return %c0_i32, %c0_i32_0, %c0_i32_1 : i32, i32, i32
  }
  func.func @transform_1(%arg0: i32) -> (i32, i32, i32) {
    %c0_i32 = arith.constant 0 : i32
    %c0_i32_0 = arith.constant 0 : i32
    %c0_i32_1 = arith.constant 0 : i32
    %c0_i32_2 = arith.constant 0 : i32
    return %c0_i32, %c0_i32_0, %c0_i32_1 : i32, i32, i32
  }
  func.func @transform_2(%arg0: i32) -> (i32, i32, i32) {
    %c0_i32 = arith.constant 0 : i32
    %c0_i32_0 = arith.constant 0 : i32
    %c0_i32_1 = arith.constant 0 : i32
    %c0_i32_2 = arith.constant 0 : i32
    return %c0_i32, %c0_i32_0, %c0_i32_1 : i32, i32, i32
  }
  func.func @transform_3(%arg0: i32) -> (i32, i32, i32) {
    %c0_i32 = arith.constant 0 : i32
    %c0_i32_0 = arith.constant 0 : i32
    %c0_i32_1 = arith.constant 0 : i32
    %c0_i32_2 = arith.constant 0 : i32
    return %c0_i32, %c0_i32_0, %c0_i32_1 : i32, i32, i32
  }
  func.func @transform_4(%arg0: i32) -> (i32, i32, i32) {
    %c0_i32 = arith.constant 0 : i32
    %c0_i32_0 = arith.constant 0 : i32
    %c0_i32_1 = arith.constant 0 : i32
    %c0_i32_2 = arith.constant 0 : i32
    return %c0_i32, %c0_i32_0, %c0_i32_1 : i32, i32, i32
  }
}

</mosaic_0001>

<bundles_post_ra>
// kernel: tpu_custom_call.1
= control target key start
LH: loop header
LB: loop body
LE: loop exit
PB: predicated region body
PF: predicated region fallthrough
CT: control target
= control target key end

     0   :  { %9 = vsyncpa [#allocation4], 0  ;;  %s2511_s0 = inlined_call_operand.hbm [shape: f32[2,8,48], index: 0, kind: input, shape index: {}]   ;;  %s2512_s1 = inlined_call_operand.hbm [shape: f32[2,8,48], index: 1, kind: input, shape index: {}]   ;;  %s2513_s2 = inlined_call_operand.hbm [shape: f32[2,8,48], index: 2, kind: input, shape index: {}]   ;;  %s2514_s3 = inlined_call_operand.vmem [shape: f32[2,1,48], index: 3, kind: input, shape index: {}]   ;;  %s2515_s4 = inlined_call_operand.hbm [shape: f32[2,8,48], index: 4, kind: output, shape index: {}]  }
   0x1   :  { %10 = vsyncpa [#allocation7], 0 }
   0x2   :  { %11 = vsyncpa [#allocation5], 0  ;;  %s29_s17 = sshll.u32 %s2512_s1, 4  ;;  %s2324_s18 = smov [#allocation6]   ;;  %s30_s17 = int_to_ptr.hbm [resolvable:$true] %s29_s17 }
   0x3   :  { %s31_s19 = sshll.u32 %s2324_s18, 4  ;;  %s16_s22 = sshll.u32 %s2511_s0, 4  ;;  %s32_s19 = int_to_ptr.vmem [resolvable:$true] %s31_s19  ;;  %s17_s22 = int_to_ptr.hbm [resolvable:$true] %s16_s22 }
   0x4   :  { %s2325_s23 = smov 128   ;;  %s2326_s24 = smov 8  }
   0x5   :  { %37 = dma.hbm_to_vmem [thread:$0]  %s30_s17, 256, %s32_s19, [#allocation7], %s2325_s23, %s2325_s23, %s2326_s24  }
   0x6   :  { %s2327_s25 = smov [#allocation3]   ;;  %s42_s1 = sshll.u32 %s2513_s2, 4  ;;  %s43_s1 = int_to_ptr.hbm [resolvable:$true] %s42_s1 }
   0x7   :  { %s18_s26 = sshll.u32 %s2327_s25, 4  ;;  %s2328_s0 = smov [#allocation8]   ;;  %s19_s26 = int_to_ptr.vmem [resolvable:$true] %s18_s26 }
   0x8   :  { %24 = dma.hbm_to_vmem [thread:$0]  %s17_s22, 256, %s19_s26, [#allocation4], %s2325_s23, %s2325_s23, %s2326_s24  }
   0x9   :  { %s44_s29 = sshll.u32 %s2328_s0, 4  ;;  %s45_s29 = int_to_ptr.vmem [resolvable:$true] %s44_s29 }
   0xa   :  { %50 = dma.hbm_to_vmem [thread:$0]  %s43_s1, 256, %s45_s29, [#allocation7], %s2325_s23, %s2325_s23, %s2326_s24  }
   0xb   :  { %2318 = dma.done.wait [#allocation4], 256  }
   0xc   :  { %2319 = vsyncadd [#allocation4], 4294967040 }
   0xd   :  { %2320 = dma.done.wait [#allocation7], 512  }
   0xe   :  { %2321 = vsyncadd [#allocation7], 4294966784  ;;  %vm71_vm0 = vcmask 130048   ;;  %v2378_v0 = vld [vmem:[#allocation6] sm:$0xff]  ;;  %v2380_v1 = vld [vmem:[#allocation3] sm:$0xff]  ;;  %vm376_vm1 = vcmask 64512  }
   0xf   :  { %v2382_v2 = vld [vmem:[#allocation6 + $0x8] sm:$0xff]  ;;  %v76_v3 = vsel %vm71_vm0, %v2378_v0, 0  ;;  %v73_v4 = vsel %vm71_vm0, %v2380_v1, 0  ;;  %v2390_v6 = vld [vmem:[#allocation3 + $0x8] sm:$0xff]  ;;  %s2329_s2 = smov 112   ;;  %v2409_v62 = vld [vmem:[#allocation8] sm:$0xff] }
  0x10   :  { %v228_v5 = vsel %vm71_vm0, %v2382_v2, 0  ;;  %v93_v7 = vand.u32 4294901760, %v76_v3  ;;  %v95_v8 = vand.u32 4294901760, %v73_v4  ;;  %v225_v10 = vsel %vm71_vm0, %v2390_v6, 0  ;;  %735 = vrot.lane.b32.xlu2 %v2378_v0, %s2329_s2  ;;  %s2330_s30 = smov 96   ;;  %s2331_s5 = smov 16  }
  0x11   :  { %v245_v9 = vand.u32 4294901760, %v228_v5  ;;  %v247_v11 = vand.u32 4294901760, %v225_v10  ;;  %v443_v63 = vand.u32 4294901760, %v2409_v62  ;;  %s2332_s6 = smov 32   ;;  %s2334_s11 = smov [#allocation9]  }
  0x12   :  { %v120_v12 = vsub.f32 %v76_v3, %v93_v7  ;;  %170 = vmatpush.xpose.msra.mxu3 %v93_v7  ;;  %94 = vmatpush.xpose.msra.mxu0 %v93_v7  ;;  %v96_v13 = vsub.f32 %v73_v4, %v95_v8  ;;  %s2163_s12 = sshll.u32 %s2334_s11, 4  ;;  %s2164_s12 = int_to_ptr.vmem [resolvable:$true] %s2163_s12 }
  0x13   :  { %v272_v14 = vsub.f32 %v228_v5, %v245_v9  ;;  %v248_v15 = vsub.f32 %v225_v10, %v247_v11  ;;  %v470_v3 = vsub.f32 %v2409_v62, %v443_v63 }
  0x14   :  { %147 = vmatpush.xpose.msra.mxu2 %v120_v12  ;;  %v97_v16 = vand.u32 4294901760, %v96_v13  ;;  %v121_v17 = vand.u32 4294901760, %v120_v12 }
  0x15   :  { %v273_v18 = vand.u32 4294901760, %v272_v14  ;;  %v249_v19 = vand.u32 4294901760, %v248_v15  ;;  %v471_v4 = vand.u32 4294901760, %v470_v3 }
  0x16   :  { %174 = vmatmul.f32.vlgmr.msra.gmra.mxu3 %v97_v16  ;;  %v98_v20 = vsub.f32 %v96_v13, %v97_v16  ;;  %v122_v21 = vsub.f32 %v120_v12, %v121_v17  ;;  %196 = vmatpush.xpose.msrb.mxu0 %v121_v17 }
  0x17   :  { %v274_v22 = vsub.f32 %v272_v14, %v273_v18  ;;  %150 = vmatmul.f32.vlgmr.msra.gmra.mxu2 %v96_v13  ;;  %v250_v23 = vsub.f32 %v248_v15, %v249_v19  ;;  %v472_v5 = vsub.f32 %v470_v3, %v471_v4 }
  0x18   :  { %246 = vmatpush.xpose.msrb.mxu2 %v245_v9  ;;  %v99_v24 = vand.u32 4294901760, %v98_v20  ;;  %v123_v25 = vand.u32 4294901760, %v122_v21  ;;  %732 = vrot.lane.b32.xlu2 %v2380_v1, %s2329_s2 }
  0x19   :  { %v275_v26 = vand.u32 4294901760, %v274_v22  ;;  %v251_v27 = vand.u32 4294901760, %v250_v23 }
  0x1a   :  { %100 = vmatmul.f32.vlgmr.msra.gmra.mxu0 %v99_v24  ;;  %124 = vmatpush.xpose.msra.mxu1 %v123_v25 }
  0x1b   :  { %276 = vmatpush.xpose.msrb.mxu3 %v275_v26  ;;  %299 = vmatpush.xpose.msra.mxu0 %v272_v14 }
  0x1c   :  { %348 = vmatpush.xpose.msra.mxu2 %v273_v18 }
  0x1d   :  { %126 = vmatmul.f32.vlgmr.msra.gmra.mxu1 %v95_v8 }
  0x1e   :  { %218 = vmatpush.xpose.msrb.mxu1 %v93_v7  ;;  %278 = vmatmul.f32.vlgmr.msrb.gmra.mxu3 %v247_v11  ;;  %v473_v7 = vand.u32 4294901760, %v472_v5 }
  0x1f   :  { %370 = vmatpush.xpose.msra.mxu3 %v245_v9  ;;  %252 = vmatmul.f32.vlgmr.msrb.gmra.mxu2 %v251_v27 }
  0x20   :  { %497 = vmatpush.msrb.mxu2 %v470_v3 }
  0x22   :  { %322 = vmatpush.xpose.msra.mxu1 %v245_v9  ;;  %198 = vmatmul.f32.vlgmr.msrb.gmra.mxu0 %v95_v8 }
  0x23   :  { %520 = vmatpush.msrb.mxu3 %v443_v63  ;;  %444 = vmatpush.msrb.mxu0 %v443_v63 }
  0x25   :  { %220 = vmatmul.f32.vlgmr.msrb.gmra.mxu1 %v95_v8  ;;  %v2413_v8 = vld [vmem:[#allocation8 + $0x8] sm:$0xff] }
  0x26   :  { %372 = vmatmul.f32.vlgmr.msra.gmra.mxu3 %v247_v11  ;;  %474 = vmatpush.msrb.mxu1 %v473_v7  ;;  %v592_v9 = vand.u32 4294901760, %v2413_v8 }
  0x27   :  { %350 = vmatmul.f32.vlgmr.msra.gmra.mxu2 %v247_v11 }
  0x28   :  { %v2417_v10 = vsub.f32 %v2413_v8, %v592_v9  ;;  %593 = vmatpush.msra.mxu2 %v592_v9 }
  0x2a   :  { %302 = vmatmul.f32.vlgmr.msra.gmra.mxu0 %v248_v15  ;;  %v620_v11 = vand.u32 4294901760, %v2417_v10 }
  0x2b   :  { %546 = vmatpush.msra.mxu0 %v471_v4 }
  0x2c   :  { %v621_v12 = vsub.f32 %v2417_v10, %v620_v11 }
  0x2d   :  { %326 = vmatmul.f32.vlgmr.msra.gmra.mxu1 %v249_v19 }
  0x2e   :  { %568 = vmatpush.msra.mxu1 %v443_v63  ;;  %v622_v14 = vand.u32 4294901760, %v621_v12 }
  0x30   :  { %623 = vmatpush.msra.mxu3 %v622_v14 }
  0x6a   :  { %v736_v15 = vpop.permute.xlu2 %735 }
  0x6b   :  { %v739_v18 = vsel %vm71_vm0, %v736_v15, 0 }
  0x6c   :  { %v2422_v21 = vand.u32 4294901760, %v739_v18 }
  0x6e   :  { %v2425_v27 = vsub.f32 %v739_v18, %v2422_v21 }
  0x97   :  { %v101_v28 = vpop.f32.mrf.mxu0 }
  0x99   :  { %v175_v29 = vpop.f32.mrf.mxu3 }
  0x9a   :  { %v127_v30 = vpop.f32.mrf.mxu1  ;;  %v151_v31 = vpop.f32.mrf.mxu2 }
  0x9b   :  { %v128_v32 = vadd.f32 %v127_v30, %v101_v28 }
  0x9d   :  { %v152_v33 = vadd.f32 %v151_v31, %v128_v32 }
  0x9f   :  { %v176_v34 = vadd.f32 %v175_v29, %v152_v33  ;;  %v199_v35 = vpop.f32.mrf.mxu0  ;;  %v784_v33 = vand.u32 4294901760, %v2425_v27 }
  0xa1   :  { %v200_v36 = vadd.f32 %v199_v35, %v176_v34  ;;  %v279_v37 = vpop.f32.mrf.mxu3 }
  0xa2   :  { %v221_v38 = vpop.f32.mrf.mxu1  ;;  %v253_v39 = vpop.f32.mrf.mxu2 }
  0xa3   :  { %v222_v40 = vadd.f32 %v221_v38, %v200_v36  ;;  %v280_v41 = vadd.f32 %v279_v37, %v253_v39 }
  0xa5   :  { %v377_v42 = vsel %vm376_vm1, %v222_v40, -inf }
  0xa6   :  { %378 = vmax.xlane.f32.xlu0 %v377_v42 }
  0xa7   :  { %v303_v43 = vpop.f32.mrf.mxu0 }
  0xa8   :  { %v304_v44 = vadd.f32 %v303_v43, %v280_v41  ;;  %v785_v41 = vsub.f32 %v2425_v27, %v784_v33 }
  0xa9   :  { %v373_v48 = vpop.f32.mrf.mxu3 }
  0xaa   :  { %v327_v45 = vpop.f32.mrf.mxu1  ;;  %v351_v46 = vpop.f32.mrf.mxu2 }
  0xab   :  { %v328_v47 = vadd.f32 %v327_v45, %v304_v44 }
  0xad   :  { %v352_v49 = vadd.f32 %v351_v46, %v328_v47 }
  0xaf   :  { %v374_v50 = vadd.f32 %v373_v48, %v352_v49 }
  0xb1   :  { %v380_v51 = vsel %vm376_vm1, %v374_v50, -inf }
  0xb2   :  { %381 = vmax.xlane.f32.xlu0 %v380_v51 }
  0xc6   :  { %891 = vrot.lane.b32.xlu0 %v2382_v2, %s2329_s2 }
 0x119   :  { %v379_v52 = vpop.xlane.xlu0 %378 }
 0x11a   :  { %v383_v53 = vsub.f32 %v222_v40, %v379_v52 }
 0x11c   :  { %v385_v54 = vmul.f32 1.442695, %v383_v53 }
 0x11e   :  { %2192 = vpow2.f32 %v385_v54  ;;  %v733_v54 = vpop.permute.xlu2 %732 }
 0x124   :  { %v2193_v55 = vpop.eup %2192 }
 0x125   :  { %v382_v56 = vpop.xlane.xlu0 %381  ;;  %v389_v57 = vsel %vm376_vm1, %v2193_v55, 0.0 }
 0x126   :  { %v384_v58 = vsub.f32 %v374_v50, %v382_v56  ;;  %390 = vadd.xlane.f32.xlu1 %v389_v57  ;;  %v786_v50 = vand.u32 4294901760, %v785_v41 }
 0x128   :  { %v387_v59 = vmul.f32 1.442695, %v384_v58  ;;  %v737_v58 = vsel %vm71_vm0, %v733_v54, 0 }
 0x129   :  { %v758_v63 = vand.u32 4294901760, %v737_v58 }
 0x12a   :  { %2194 = vpow2.f32 %v387_v59 }
 0x130   :  { %v2403_v60 = vpop.eup %2194 }
 0x131   :  { %v392_v61 = vsel %vm376_vm1, %v2403_v60, 0.0 }
 0x132   :  { %393 = vadd.xlane.f32.xlu1 %v392_v61 }
 0x138   :  { %v892_v31 = vpop.permute.xlu0 %891 }
 0x139   :  { %v895_v37 = vsel %vm71_vm0, %v892_v31, 0 }
 0x13a   :  { %v912_v44 = vand.u32 4294901760, %v895_v37 }
 0x13c   :  { %v939_v51 = vsub.f32 %v895_v37, %v912_v44 }
 0x13e   :  { %v940_v57 = vand.u32 4294901760, %v939_v51 }
 0x140   :  { %v941_v3 = vsub.f32 %v939_v51, %v940_v57 }
 0x142   :  { %v942_v7 = vand.u32 4294901760, %v941_v3 }
 0x14b   :  { %888 = vrot.lane.b32.xlu1 %v2390_v6, %s2329_s2 }
 0x199   :  { %v391_v13 = vpop.xlane.xlu1 %390 }
 0x19a   :  { %2196 = vrcp.f32 %v391_v13  ;;  %v406_v20 = vand.u32 2147483648, %v391_v13  ;;  %v404_v23 = vand.u32 2147483647, %v391_v13  ;;  %vm400_vm3 = vweird.f32 %v391_v13 }
 0x19c   :  { %v407_v26 = vor.u32 1.1754944e-38, %v406_v20  ;;  %vm405_vm5 = vcmp.eq.f32.partialorder %v404_v23, 8.507059e+37 }
 0x1a0   :  { %v2197_v16 = vpop.eup %2196 }
 0x1a1   :  { %v396_v17 = vmul.f32 %v2197_v16, %v391_v13  ;;  %vm401_vm2 = vweird.f32 %v2197_v16 }
 0x1a2   :  { %vm402_vm4 = vmor %vm400_vm3, %vm401_vm2 }
 0x1a3   :  { %v397_v19 = vsub.f32 1.0, %v396_v17 }
 0x1a5   :  { %v398_v22 = vmul.f32 %v2197_v16, %v397_v19  ;;  %v394_v24 = vpop.xlane.xlu1 %393 }
 0x1a6   :  { %2198 = vrcp.f32 %v394_v24  ;;  %v421_v39 = vand.u32 2147483648, %v394_v24  ;;  %v419_v43 = vand.u32 2147483647, %v394_v24  ;;  %vm415_vm7 = vweird.f32 %v394_v24 }
 0x1a7   :  { %v399_v25 = vadd.f32 %v2197_v16, %v398_v22 }
 0x1a8   :  { %v422_v47 = vor.u32 1.1754944e-38, %v421_v39  ;;  %vm420_vm9 = vcmp.eq.f32.partialorder %v419_v43, 8.507059e+37 }
 0x1a9   :  { %v403_v28 = vsel %vm402_vm4, %v2197_v16, %v399_v25 }
 0x1aa   :  { %v408_v29 = vsel %vm405_vm5, %v407_v26, %v403_v28 }
 0x1ab   :  { %v409_v30 = vmul.f32 %v2193_v55, %v408_v29 }
 0x1ac   :  { %v2199_v32 = vpop.eup %2198 }
 0x1ad   :  { %v411_v34 = vmul.f32 %v2199_v32, %v394_v24  ;;  %v426_v35 = vsel %vm376_vm1, %v409_v30, 0  ;;  %vm416_vm6 = vweird.f32 %v2199_v32 }
 0x1ae   :  { %v445_v36 = vand.u32 4294901760, %v426_v35  ;;  %vm417_vm8 = vmor %vm415_vm7, %vm416_vm6 }
 0x1af   :  { %v412_v38 = vsub.f32 1.0, %v411_v34 }
 0x1b0   :  { %476 = vmatmul.f32.vlgmr.msrb.gmra.mxu1 %v445_v36  ;;  %v446_v40 = vsub.f32 %v426_v35, %v445_v36 }
 0x1b1   :  { %v413_v42 = vmul.f32 %v2199_v32, %v412_v38  ;;  %669 = vmatpush.msrb.mxu1 %v592_v9 }
 0x1b2   :  { %500 = vmatmul.f32.vlgmr.msrb.gmra.mxu2 %v446_v40  ;;  %v447_v45 = vand.u32 4294901760, %v446_v40 }
 0x1b3   :  { %v414_v46 = vadd.f32 %v2199_v32, %v413_v42  ;;  %695 = vmatpush.msrb.mxu2 %v620_v11 }
 0x1b4   :  { %524 = vmatmul.f32.vlgmr.msrb.gmra.mxu3 %v447_v45  ;;  %v448_v48 = vsub.f32 %v446_v40, %v447_v45 }
 0x1b5   :  { %v418_v49 = vsel %vm417_vm8, %v2199_v32, %v414_v46  ;;  %717 = vmatpush.msrb.mxu3 %v592_v9 }
 0x1b6   :  { %v423_v52 = vsel %vm420_vm9, %v422_v47, %v418_v49  ;;  %v449_v53 = vand.u32 4294901760, %v448_v48 }
 0x1b7   :  { %v424_v55 = vmul.f32 %v2403_v60, %v423_v52  ;;  %v759_v60 = vsub.f32 %v737_v58, %v758_v63 }
 0x1b8   :  { %450 = vmatmul.f32.vlgmr.msrb.gmra.mxu0 %v449_v53  ;;  %570 = vmatmul.f32.vlgmr.msra.gmra.mxu1 %v445_v36 }
 0x1b9   :  { %v575_v56 = vsel %vm376_vm1, %v424_v55, 0  ;;  %646 = vmatpush.msrb.mxu0 %v2417_v10  ;;  %787 = vmatpush.xpose.msra.mxu1 %v786_v50  ;;  %v760_v10 = vand.u32 4294901760, %v759_v60 }
 0x1ba   :  { %v594_v59 = vand.u32 4294901760, %v575_v56 }
 0x1bb   :  { %v761_v13 = vsub.f32 %v759_v60, %v760_v10 }
 0x1bc   :  { %v595_v61 = vsub.f32 %v575_v56, %v594_v59  ;;  %625 = vmatmul.f32.vlgmr.msra.gmra.mxu3 %v594_v59 }
 0x1bd   :  { %833 = vmatpush.xpose.msra.mxu3 %v2422_v21  ;;  %v889_v11 = vpop.permute.xlu1 %888  ;;  %v762_v15 = vand.u32 4294901760, %v761_v13 }
 0x1be   :  { %v596_v4 = vand.u32 4294901760, %v595_v61  ;;  %v893_v12 = vsel %vm71_vm0, %v889_v11, 0 }
 0x1bf   :  { %v914_v14 = vand.u32 4294901760, %v893_v12 }
 0x1c0   :  { %548 = vmatmul.f32.vlgmr.msra.gmra.mxu0 %v445_v36  ;;  %673 = vmatmul.f32.vlgmr.msrb.gmra.mxu1 %v596_v4  ;;  %v597_v5 = vsub.f32 %v595_v61, %v596_v4 }
 0x1c1   :  { %757 = vmatpush.xpose.msra.mxu0 %v2422_v21  ;;  %881 = vmatpush.xpose.msrb.mxu1 %v2422_v21  ;;  %v915_v16 = vsub.f32 %v893_v12, %v914_v14 }
 0x1c2   :  { %v598_v9 = vand.u32 4294901760, %v597_v5 }
 0x1c3   :  { %v916_v17 = vand.u32 4294901760, %v915_v16 }
 0x1c4   :  { %599 = vmatmul.f32.vlgmr.msra.gmra.mxu2 %v598_v9  ;;  %719 = vmatmul.f32.vlgmr.msrb.gmra.mxu3 %v594_v59 }
 0x1c5   :  { %810 = vmatpush.xpose.msra.mxu2 %v2425_v27  ;;  %943 = vmatpush.xpose.msrb.mxu3 %v942_v7  ;;  %v917_v18 = vsub.f32 %v915_v16, %v916_v17 }
 0x1c7   :  { %v918_v19 = vand.u32 4294901760, %v917_v18 }
 0x1c8   :  { %649 = vmatmul.f32.vlgmr.msrb.gmra.mxu0 %v595_v61  ;;  %789 = vmatmul.f32.vlgmr.msra.gmra.mxu1 %v758_v63 }
 0x1c9   :  { %859 = vmatpush.xpose.msrb.mxu0 %v784_v33  ;;  %989 = vmatpush.xpose.msra.mxu1 %v912_v44 }
 0x1cc   :  { %697 = vmatmul.f32.vlgmr.msrb.gmra.mxu2 %v594_v59  ;;  %837 = vmatmul.f32.vlgmr.msra.gmra.mxu3 %v760_v10 }
 0x1cd   :  { %913 = vmatpush.xpose.msrb.mxu2 %v912_v44  ;;  %1037 = vmatpush.xpose.msra.mxu3 %v912_v44 }
 0x1d0   :  { %763 = vmatmul.f32.vlgmr.msra.gmra.mxu0 %v762_v15  ;;  %883 = vmatmul.f32.vlgmr.msrb.gmra.mxu1 %v758_v63 }
 0x1d1   :  { %966 = vmatpush.xpose.msra.mxu0 %v939_v51 }
 0x1d4   :  { %813 = vmatmul.f32.vlgmr.msra.gmra.mxu2 %v759_v60  ;;  %945 = vmatmul.f32.vlgmr.msrb.gmra.mxu3 %v914_v14 }
 0x1d5   :  { %1015 = vmatpush.xpose.msra.mxu2 %v940_v57 }
 0x1d8   :  { %861 = vmatmul.f32.vlgmr.msrb.gmra.mxu0 %v758_v63  ;;  %993 = vmatmul.f32.vlgmr.msra.gmra.mxu1 %v916_v17 }
 0x1dc   :  { %919 = vmatmul.f32.vlgmr.msrb.gmra.mxu2 %v918_v19  ;;  %1039 = vmatmul.f32.vlgmr.msra.gmra.mxu3 %v914_v14 }
 0x1e0   :  { %969 = vmatmul.f32.vlgmr.msra.gmra.mxu0 %v915_v16 }
 0x1e4   :  { %1017 = vmatmul.f32.vlgmr.msra.gmra.mxu2 %v914_v14 }
 0x22d   :  { %v477_v20 = vpop.f32.mrf.mxu1 }
 0x235   :  { %v451_v21 = vpop.f32.mrf.mxu0  ;;  %v501_v23 = vpop.f32.mrf.mxu2 }
 0x236   :  { %v478_v22 = vadd.f32 %v477_v20, %v451_v21  ;;  %v571_v27 = vpop.f32.mrf.mxu1 }
 0x237   :  { %v525_v24 = vpop.f32.mrf.mxu3 }
 0x238   :  { %v502_v25 = vadd.f32 %v501_v23, %v478_v22 }
 0x23a   :  { %v526_v26 = vadd.f32 %v525_v24, %v502_v25 }
 0x23d   :  { %v549_v28 = vpop.f32.mrf.mxu0 }
 0x23e   :  { %v550_v29 = vadd.f32 %v549_v28, %v526_v26  ;;  %v674_v33 = vpop.f32.mrf.mxu1 }
 0x23f   :  { %v626_v31 = vpop.f32.mrf.mxu3 }
 0x240   :  { %v572_v30 = vadd.f32 %v571_v27, %v550_v29 }
 0x242   :  { %723 = vst.msk [vmem:[#allocation2] sm:$0xff] %vm71_vm0, %v572_v30 }
 0x245   :  { %v650_v32 = vpop.f32.mrf.mxu0 }
 0x246   :  { %v790_v42 = vpop.f32.mrf.mxu1 }
 0x247   :  { %v600_v34 = vpop.f32.mrf.mxu2  ;;  %v720_v37 = vpop.f32.mrf.mxu3 }
 0x248   :  { %v627_v35 = vadd.f32 %v626_v31, %v600_v34 }
 0x24a   :  { %v651_v36 = vadd.f32 %v650_v32, %v627_v35 }
 0x24c   :  { %v675_v39 = vadd.f32 %v674_v33, %v651_v36 }
 0x24d   :  { %v764_v38 = vpop.f32.mrf.mxu0 }
 0x24e   :  { %v791_v45 = vadd.f32 %v790_v42, %v764_v38  ;;  %v884_v50 = vpop.f32.mrf.mxu1 }
 0x24f   :  { %v698_v40 = vpop.f32.mrf.mxu2  ;;  %v838_v44 = vpop.f32.mrf.mxu3 }
 0x250   :  { %v699_v41 = vadd.f32 %v698_v40, %v675_v39 }
 0x252   :  { %v721_v43 = vadd.f32 %v720_v37, %v699_v41 }
 0x254   :  { %724 = vst.msk [vmem:[#allocation2 + $0x8] sm:$0xff] %vm71_vm0, %v721_v43 }
 0x255   :  { %v862_v46 = vpop.f32.mrf.mxu0 }
 0x256   :  { %v994_v59 = vpop.f32.mrf.mxu1 }
 0x257   :  { %v814_v47 = vpop.f32.mrf.mxu2  ;;  %v946_v53 = vpop.f32.mrf.mxu3 }
 0x258   :  { %v815_v48 = vadd.f32 %v814_v47, %v791_v45 }
 0x25a   :  { %v839_v49 = vadd.f32 %v838_v44, %v815_v48 }
 0x25c   :  { %v863_v51 = vadd.f32 %v862_v46, %v839_v49 }
 0x25d   :  { %v970_v57 = vpop.f32.mrf.mxu0 }
 0x25e   :  { %v885_v52 = vadd.f32 %v884_v50, %v863_v51 }
 0x25f   :  { %v920_v54 = vpop.f32.mrf.mxu2  ;;  %v1040_v4 = vpop.f32.mrf.mxu3 }
 0x260   :  { %v947_v55 = vadd.f32 %v946_v53, %v920_v54  ;;  %v1043_v56 = vsel %vm376_vm1, %v885_v52, -inf }
 0x261   :  { %1044 = vmax.xlane.f32.xlu2 %v1043_v56 }
 0x262   :  { %v971_v58 = vadd.f32 %v970_v57, %v947_v55 }
 0x264   :  { %v995_v61 = vadd.f32 %v994_v59, %v971_v58 }
 0x267   :  { %v1018_v63 = vpop.f32.mrf.mxu2 }
 0x268   :  { %v1019_v3 = vadd.f32 %v1018_v63, %v995_v61 }
 0x26a   :  { %v1041_v60 = vadd.f32 %v1040_v4, %v1019_v3 }
 0x26c   :  { %v1046_v5 = vsel %vm376_vm1, %v1041_v60, -inf }
 0x26d   :  { %1047 = vmax.xlane.f32.xlu0 %v1046_v5 }
 0x279   :  { %1092 = vrot.lane.b32.xlu2 %v2409_v62, %s2329_s2 }
 0x281   :  { %1245 = vrot.lane.b32.xlu0 %v2413_v8, %s2329_s2 }
 0x289   :  { %1571 = vrot.lane.b32.xlu0 %v2390_v6, %s2330_s30 }
 0x2d4   :  { %v1045_v7 = vpop.xlane.xlu2 %1044 }
 0x2d5   :  { %v1049_v9 = vsub.f32 %v885_v52, %v1045_v7 }
 0x2d7   :  { %v1051_v10 = vmul.f32 1.442695, %v1049_v9 }
 0x2d9   :  { %2200 = vpow2.f32 %v1051_v10 }
 0x2dc   :  { %v1093_v11 = vpop.permute.xlu2 %1092 }
 0x2dd   :  { %v1113_v12 = vand.u32 4294901760, %v1093_v11 }
 0x2df   :  { %v2201_v13 = vpop.eup %2200  ;;  %v1140_v14 = vsub.f32 %v1093_v11, %v1113_v12  ;;  %1114 = vmatpush.msrb.mxu0 %v1113_v12  ;;  %1190 = vmatpush.msrb.mxu3 %v1113_v12 }
 0x2e0   :  { %v1048_v15 = vpop.xlane.xlu0 %1047  ;;  %v1055_v16 = vsel %vm376_vm1, %v2201_v13, 0.0 }
 0x2e1   :  { %v1050_v17 = vsub.f32 %v1041_v60, %v1048_v15  ;;  %1056 = vadd.xlane.f32.xlu1 %v1055_v16  ;;  %v1141_v18 = vand.u32 4294901760, %v1140_v14  ;;  %1167 = vmatpush.msrb.mxu2 %v1140_v14 }
 0x2e3   :  { %v1053_v19 = vmul.f32 1.442695, %v1050_v17  ;;  %v1142_v20 = vsub.f32 %v1140_v14, %v1141_v18  ;;  %1216 = vmatpush.msra.mxu0 %v1141_v18 }
 0x2e5   :  { %2202 = vpow2.f32 %v1053_v19  ;;  %v1143_v6 = vand.u32 4294901760, %v1142_v20 }
 0x2e7   :  { %1144 = vmatpush.msrb.mxu1 %v1143_v6 }
 0x2e9   :  { %1238 = vmatpush.msra.mxu1 %v1113_v12 }
 0x2eb   :  { %v2455_v21 = vpop.eup %2202 }
 0x2ec   :  { %v1058_v22 = vsel %vm376_vm1, %v2455_v21, 0.0 }
 0x2ed   :  { %1059 = vadd.xlane.f32.xlu2 %v1058_v22 }
 0x2f3   :  { %v1246_v23 = vpop.permute.xlu0 %1245 }
 0x2f4   :  { %v1266_v24 = vand.u32 4294901760, %v1246_v23 }
 0x2f6   :  { %v1293_v25 = vsub.f32 %v1246_v23, %v1266_v24  ;;  %1267 = vmatpush.msra.mxu2 %v1266_v24 }
 0x2f8   :  { %v1294_v26 = vand.u32 4294901760, %v1293_v25 }
 0x2fa   :  { %1418 = vrot.lane.b32.xlu1 %v2378_v0, %s2330_s30  ;;  %v1295_v27 = vsub.f32 %v1293_v25, %v1294_v26 }
 0x2fb   :  { %v1572_v22 = vpop.permute.xlu0 %1571 }
 0x2fc   :  { %v1296_v29 = vand.u32 4294901760, %v1295_v27  ;;  %v1576_v23 = vsel %vm71_vm0, %v1572_v22, 0 }
 0x2fe   :  { %1297 = vmatpush.msra.mxu3 %v1296_v29 }
 0x305   :  { %1415 = vrot.lane.b32.xlu2 %v2380_v1, %s2330_s30 }
 0x30d   :  { %1574 = vrot.lane.b32.xlu2 %v2382_v2, %s2330_s30 }
 0x354   :  { %v1057_v28 = vpop.xlane.xlu1 %1056 }
 0x355   :  { %2204 = vrcp.f32 %v1057_v28  ;;  %v1072_v0 = vand.u32 2147483648, %v1057_v28  ;;  %v1070_v1 = vand.u32 2147483647, %v1057_v28  ;;  %vm1066_vm11 = vweird.f32 %v1057_v28 }
 0x357   :  { %v1073_v35 = vor.u32 1.1754944e-38, %v1072_v0  ;;  %vm1071_vm13 = vcmp.eq.f32.partialorder %v1070_v1, 8.507059e+37 }
 0x35b   :  { %v2205_v30 = vpop.eup %2204 }
 0x35c   :  { %v1062_v31 = vmul.f32 %v2205_v30, %v1057_v28  ;;  %vm1067_vm10 = vweird.f32 %v2205_v30 }
 0x35d   :  { %vm1068_vm12 = vmor %vm1066_vm11, %vm1067_vm10 }
 0x35e   :  { %v1063_v32 = vsub.f32 1.0, %v1062_v31 }
 0x360   :  { %v1064_v33 = vmul.f32 %v2205_v30, %v1063_v32  ;;  %v1060_v34 = vpop.xlane.xlu2 %1059 }
 0x361   :  { %2206 = vrcp.f32 %v1060_v34  ;;  %v1087_v45 = vand.u32 2147483648, %v1060_v34  ;;  %v1085_v48 = vand.u32 2147483647, %v1060_v34  ;;  %vm1081_vm15 = vweird.f32 %v1060_v34 }
 0x362   :  { %v1065_v2 = vadd.f32 %v2205_v30, %v1064_v33 }
 0x363   :  { %v1088_v54 = vor.u32 1.1754944e-38, %v1087_v45  ;;  %vm1086_vm3 = vcmp.eq.f32.partialorder %v1085_v48, 8.507059e+37 }
 0x364   :  { %v1069_v36 = vsel %vm1068_vm12, %v2205_v30, %v1065_v2  ;;  %vm2093_vm12 = vcmask 392192  }
 0x365   :  { %v1074_v37 = vsel %vm1071_vm13, %v1073_v35, %v1069_v36 }
 0x366   :  { %v1075_v38 = vmul.f32 %v2201_v13, %v1074_v37 }
 0x367   :  { %v2207_v39 = vpop.eup %2206 }
 0x368   :  { %v1077_v40 = vmul.f32 %v2207_v39, %v1060_v34  ;;  %v1096_v41 = vsel %vm376_vm1, %v1075_v38, 0  ;;  %v1416_v42 = vpop.permute.xlu2 %1415  ;;  %vm1082_vm14 = vweird.f32 %v2207_v39 }
 0x369   :  { %v1115_v43 = vand.u32 4294901760, %v1096_v41  ;;  %vm1083_vm2 = vmor %vm1081_vm15, %vm1082_vm14  ;;  %v1420_v7 = vsel %vm71_vm0, %v1416_v42, 0 }
 0x36a   :  { %v1078_v44 = vsub.f32 1.0, %v1077_v40  ;;  %v1441_v14 = vand.u32 4294901760, %v1420_v7 }
 0x36b   :  { %1146 = vmatmul.f32.vlgmr.msrb.gmra.mxu1 %v1115_v43  ;;  %v1116_v46 = vsub.f32 %v1096_v41, %v1115_v43 }
 0x36c   :  { %v1079_v47 = vmul.f32 %v2207_v39, %v1078_v44  ;;  %1343 = vmatpush.msrb.mxu1 %v1266_v24  ;;  %v1419_v49 = vpop.permute.xlu1 %1418  ;;  %v1442_v18 = vsub.f32 %v1420_v7, %v1441_v14 }
 0x36d   :  { %1170 = vmatmul.f32.vlgmr.msrb.gmra.mxu2 %v1116_v46  ;;  %v1117_v50 = vand.u32 4294901760, %v1116_v46  ;;  %v1422_v51 = vsel %vm71_vm0, %v1419_v49, 0 }
 0x36e   :  { %v1080_v52 = vadd.f32 %v2207_v39, %v1079_v47  ;;  %1369 = vmatpush.msrb.mxu2 %v1294_v26  ;;  %v1439_v53 = vand.u32 4294901760, %v1422_v51 }
 0x36f   :  { %1194 = vmatmul.f32.vlgmr.msrb.gmra.mxu3 %v1117_v50  ;;  %v1118_v55 = vsub.f32 %v1116_v46, %v1117_v50 }
 0x370   :  { %v1084_v56 = vsel %vm1083_vm2, %v2207_v39, %v1080_v52  ;;  %1391 = vmatpush.msrb.mxu3 %v1266_v24  ;;  %v1466_v57 = vsub.f32 %v1422_v51, %v1439_v53  ;;  %v1575_v58 = vpop.permute.xlu2 %1574 }
 0x371   :  { %v1089_v59 = vsel %vm1086_vm3, %v1088_v54, %v1084_v56  ;;  %v1119_v61 = vand.u32 4294901760, %v1118_v55  ;;  %v1578_v63 = vsel %vm71_vm0, %v1575_v58, 0  ;;  %vm1405_vm0 = vcmask 261248  }
 0x372   :  { %v1467_v3 = vand.u32 4294901760, %v1466_v57  ;;  %v1090_v4 = vmul.f32 %v2455_v21, %v1089_v59  ;;  %v1595_v60 = vand.u32 4294901760, %v1578_v63  ;;  %v1443_v21 = vand.u32 4294901760, %v1442_v18 }
 0x373   :  { %1120 = vmatmul.f32.vlgmr.msrb.gmra.mxu0 %v1119_v61  ;;  %1240 = vmatmul.f32.vlgmr.msra.gmra.mxu1 %v1115_v43 }
 0x374   :  { %1320 = vmatpush.msrb.mxu0 %v1293_v25  ;;  %v1468_v5 = vsub.f32 %v1466_v57, %v1467_v3  ;;  %v1249_v9 = vsel %vm376_vm1, %v1090_v4, 0  ;;  %v1622_v10 = vsub.f32 %v1578_v63, %v1595_v60  ;;  %v1444_v24 = vsub.f32 %v1442_v18, %v1443_v21 }
 0x375   :  { %v1268_v11 = vand.u32 4294901760, %v1249_v9  ;;  %v1597_v25 = vand.u32 4294901760, %v1576_v23 }
 0x376   :  { %v1469_v12 = vand.u32 4294901760, %v1468_v5  ;;  %v1623_v13 = vand.u32 4294901760, %v1622_v10  ;;  %v1445_v26 = vand.u32 4294901760, %v1444_v24 }
 0x377   :  { %v1269_v15 = vsub.f32 %v1249_v9, %v1268_v11  ;;  %1299 = vmatmul.f32.vlgmr.msra.gmra.mxu3 %v1268_v11  ;;  %v1598_v27 = vsub.f32 %v1576_v23, %v1597_v25 }
 0x378   :  { %v1624_v16 = vsub.f32 %v1622_v10, %v1623_v13  ;;  %1470 = vmatpush.xpose.msra.mxu1 %v1469_v12  ;;  %1516 = vmatpush.xpose.msra.mxu3 %v1439_v53 }
 0x379   :  { %v1270_v17 = vand.u32 4294901760, %v1269_v15  ;;  %v1599_v28 = vand.u32 4294901760, %v1598_v27 }
 0x37a   :  { %v1625_v20 = vand.u32 4294901760, %v1624_v16 }
 0x37b   :  { %1218 = vmatmul.f32.vlgmr.msra.gmra.mxu0 %v1115_v43  ;;  %1347 = vmatmul.f32.vlgmr.msrb.gmra.mxu1 %v1270_v17  ;;  %v1271_v19 = vsub.f32 %v1269_v15, %v1270_v17  ;;  %v1600_v29 = vsub.f32 %v1598_v27, %v1599_v28 }
 0x37c   :  { %1440 = vmatpush.xpose.msra.mxu0 %v1439_v53  ;;  %1564 = vmatpush.xpose.msrb.mxu1 %v1439_v53 }
 0x37d   :  { %v1272_v6 = vand.u32 4294901760, %v1271_v19  ;;  %v1601_v30 = vand.u32 4294901760, %v1600_v29 }
 0x37f   :  { %1273 = vmatmul.f32.vlgmr.msra.gmra.mxu2 %v1272_v6  ;;  %1393 = vmatmul.f32.vlgmr.msrb.gmra.mxu3 %v1268_v11 }
 0x380   :  { %1493 = vmatpush.xpose.msra.mxu2 %v1466_v57  ;;  %1626 = vmatpush.xpose.msrb.mxu3 %v1625_v20 }
 0x383   :  { %1323 = vmatmul.f32.vlgmr.msrb.gmra.mxu0 %v1269_v15  ;;  %1472 = vmatmul.f32.vlgmr.msra.gmra.mxu1 %v1441_v14 }
 0x384   :  { %1542 = vmatpush.xpose.msrb.mxu0 %v1467_v3  ;;  %1672 = vmatpush.xpose.msra.mxu1 %v1595_v60 }
 0x387   :  { %1371 = vmatmul.f32.vlgmr.msrb.gmra.mxu2 %v1268_v11  ;;  %1520 = vmatmul.f32.vlgmr.msra.gmra.mxu3 %v1443_v21 }
 0x388   :  { %1596 = vmatpush.xpose.msrb.mxu2 %v1595_v60  ;;  %1720 = vmatpush.xpose.msra.mxu3 %v1595_v60 }
 0x38b   :  { %1446 = vmatmul.f32.vlgmr.msra.gmra.mxu0 %v1445_v26  ;;  %1566 = vmatmul.f32.vlgmr.msrb.gmra.mxu1 %v1441_v14 }
 0x38c   :  { %1649 = vmatpush.xpose.msra.mxu0 %v1622_v10 }
 0x38f   :  { %1496 = vmatmul.f32.vlgmr.msra.gmra.mxu2 %v1442_v18  ;;  %1628 = vmatmul.f32.vlgmr.msrb.gmra.mxu3 %v1597_v25 }
 0x390   :  { %1698 = vmatpush.xpose.msra.mxu2 %v1623_v13 }
 0x393   :  { %1544 = vmatmul.f32.vlgmr.msrb.gmra.mxu0 %v1441_v14  ;;  %1676 = vmatmul.f32.vlgmr.msra.gmra.mxu1 %v1599_v28 }
 0x397   :  { %1602 = vmatmul.f32.vlgmr.msrb.gmra.mxu2 %v1601_v30  ;;  %1722 = vmatmul.f32.vlgmr.msra.gmra.mxu3 %v1597_v25 }
 0x39b   :  { %1652 = vmatmul.f32.vlgmr.msra.gmra.mxu0 %v1598_v27 }
 0x39f   :  { %1700 = vmatmul.f32.vlgmr.msra.gmra.mxu2 %v1597_v25 }
 0x3e8   :  { %v1147_v31 = vpop.f32.mrf.mxu1 }
 0x3f0   :  { %v1121_v32 = vpop.f32.mrf.mxu0  ;;  %v1171_v33 = vpop.f32.mrf.mxu2 }
 0x3f1   :  { %v1148_v0 = vadd.f32 %v1147_v31, %v1121_v32  ;;  %v1241_v35 = vpop.f32.mrf.mxu1 }
 0x3f2   :  { %v1195_v1 = vpop.f32.mrf.mxu3 }
 0x3f3   :  { %v1172_v34 = vadd.f32 %v1171_v33, %v1148_v0 }
 0x3f5   :  { %v1196_v2 = vadd.f32 %v1195_v1, %v1172_v34 }
 0x3f8   :  { %v1219_v36 = vpop.f32.mrf.mxu0 }
 0x3f9   :  { %v1220_v37 = vadd.f32 %v1219_v36, %v1196_v2  ;;  %v1348_v41 = vpop.f32.mrf.mxu1 }
 0x3fa   :  { %v1300_v39 = vpop.f32.mrf.mxu3 }
 0x3fb   :  { %v2472_v38 = vadd.f32 %v1241_v35, %v1220_v37 }
 0x400   :  { %v1324_v40 = vpop.f32.mrf.mxu0 }
 0x401   :  { %v1473_v46 = vpop.f32.mrf.mxu1 }
 0x402   :  { %v1274_v42 = vpop.f32.mrf.mxu2  ;;  %v1394_v43 = vpop.f32.mrf.mxu3 }
 0x403   :  { %v1301_v11 = vadd.f32 %v1300_v39, %v1274_v42 }
 0x405   :  { %v1325_v12 = vadd.f32 %v1324_v40, %v1301_v11 }
 0x407   :  { %v1349_v13 = vadd.f32 %v1348_v41, %v1325_v12 }
 0x408   :  { %v1447_v44 = vpop.f32.mrf.mxu0 }
 0x409   :  { %v1474_v48 = vadd.f32 %v1473_v46, %v1447_v44  ;;  %v1567_v53 = vpop.f32.mrf.mxu1 }
 0x40a   :  { %v1372_v45 = vpop.f32.mrf.mxu2  ;;  %v1521_v47 = vpop.f32.mrf.mxu3 }
 0x40b   :  { %v1373_v14 = vadd.f32 %v1372_v45, %v1349_v13 }
 0x40d   :  { %v1395_v15 = vadd.f32 %v1394_v43, %v1373_v14 }
 0x410   :  { %v1545_v49 = vpop.f32.mrf.mxu0 }
 0x411   :  { %v1677_v3 = vpop.f32.mrf.mxu1 }
 0x412   :  { %v1497_v50 = vpop.f32.mrf.mxu2  ;;  %v1629_v56 = vpop.f32.mrf.mxu3 }
 0x413   :  { %v1498_v51 = vadd.f32 %v1497_v50, %v1474_v48 }
 0x415   :  { %v1522_v52 = vadd.f32 %v1521_v47, %v1498_v51 }
 0x417   :  { %v1546_v54 = vadd.f32 %v1545_v49, %v1522_v52 }
 0x418   :  { %v1653_v61 = vpop.f32.mrf.mxu0 }
 0x419   :  { %v1568_v55 = vadd.f32 %v1567_v53, %v1546_v54 }
 0x41a   :  { %v1603_v57 = vpop.f32.mrf.mxu2  ;;  %v1723_v7 = vpop.f32.mrf.mxu3 }
 0x41b   :  { %v1630_v58 = vadd.f32 %v1629_v56, %v1603_v57  ;;  %v1726_v59 = vsel %vm376_vm1, %v1568_v55, -inf }
 0x41c   :  { %1727 = vmax.xlane.f32.xlu2 %v1726_v59 }
 0x41d   :  { %v1654_v63 = vadd.f32 %v1653_v61, %v1630_v58 }
 0x41f   :  { %v1678_v4 = vadd.f32 %v1677_v3, %v1654_v63 }
 0x422   :  { %v1701_v60 = vpop.f32.mrf.mxu2 }
 0x423   :  { %v1702_v5 = vadd.f32 %v1701_v60, %v1678_v4 }
 0x425   :  { %v1724_v9 = vadd.f32 %v1723_v7, %v1702_v5 }
 0x427   :  { %v1729_v10 = vsel %vm376_vm1, %v1724_v9, -inf }
 0x428   :  { %1730 = vmax.xlane.f32.xlu0 %v1729_v10 }
 0x43c   :  { %1775 = vrot.lane.b32.xlu0 %v2409_v62, %s2330_s30 }
 0x444   :  { %1401 = vrot.lane.b32.xlu0 %v1395_v15, %s2331_s5 }
 0x48f   :  { %v1728_v16 = vpop.xlane.xlu2 %1727 }
 0x490   :  { %v1732_v17 = vsub.f32 %v1568_v55, %v1728_v16 }
 0x492   :  { %v1734_v18 = vmul.f32 1.442695, %v1732_v17 }
 0x494   :  { %2208 = vpow2.f32 %v1734_v18 }
 0x49a   :  { %v2209_v19 = vpop.eup %2208 }
 0x49b   :  { %v1731_v20 = vpop.xlane.xlu0 %1730  ;;  %v1738_v6 = vsel %vm376_vm1, %v2209_v19, 0.0 }
 0x49c   :  { %v1733_v21 = vsub.f32 %v1724_v9, %v1731_v20  ;;  %1739 = vadd.xlane.f32.xlu1 %v1738_v6 }
 0x49e   :  { %v1736_v22 = vmul.f32 1.442695, %v1733_v21 }
 0x4a0   :  { %2210 = vpow2.f32 %v1736_v22 }
 0x4a6   :  { %v2480_v23 = vpop.eup %2210 }
 0x4a7   :  { %v1741_v62 = vsel %vm376_vm1, %v2480_v23, 0.0 }
 0x4a8   :  { %1742 = vadd.xlane.f32.xlu2 %v1741_v62 }
 0x4ae   :  { %v1776_v24 = vpop.permute.xlu0 %1775 }
 0x4af   :  { %v1796_v25 = vand.u32 4294901760, %v1776_v24 }
 0x4b1   :  { %v1823_v26 = vsub.f32 %v1776_v24, %v1796_v25  ;;  %1797 = vmatpush.msrb.mxu0 %v1796_v25  ;;  %1873 = vmatpush.msrb.mxu3 %v1796_v25 }
 0x4b3   :  { %v1824_v27 = vand.u32 4294901760, %v1823_v26  ;;  %1850 = vmatpush.msrb.mxu2 %v1823_v26 }
 0x4b5   :  { %v1825_v28 = vsub.f32 %v1823_v26, %v1824_v27  ;;  %1928 = vrot.lane.b32.xlu1 %v2413_v8, %s2330_s30  ;;  %1899 = vmatpush.msra.mxu0 %v1824_v27 }
 0x4b6   :  { %v1402_v29 = vpop.permute.xlu0 %1401 }
 0x4b7   :  { %v1826_v30 = vand.u32 4294901760, %v1825_v28  ;;  %1407 = vst.msk [vmem:[#allocation2 + $0x8] sm:$0xff] %vm1405_vm0, %v1402_v29 }
 0x4b9   :  { %1827 = vmatpush.msrb.mxu1 %v1826_v30 }
 0x4bb   :  { %1921 = vmatpush.msra.mxu1 %v1796_v25 }
 0x4c0   :  { %1399 = vrot.lane.b32.xlu2 %v2472_v38, %s2331_s5 }
 0x50f   :  { %v1740_v31 = vpop.xlane.xlu1 %1739 }
 0x510   :  { %2212 = vrcp.f32 %v1740_v31  ;;  %v1755_v1 = vand.u32 2147483648, %v1740_v31  ;;  %v1753_v2 = vand.u32 2147483647, %v1740_v31  ;;  %vm1749_vm5 = vweird.f32 %v1740_v31 }
 0x512   :  { %v1756_v36 = vor.u32 1.1754944e-38, %v1755_v1  ;;  %vm1754_vm7 = vcmp.eq.f32.partialorder %v1753_v2, 8.507059e+37 }
 0x516   :  { %v2213_v32 = vpop.eup %2212 }
 0x517   :  { %v1745_v0 = vmul.f32 %v2213_v32, %v1740_v31  ;;  %vm1750_vm4 = vweird.f32 %v2213_v32 }
 0x518   :  { %vm1751_vm6 = vmor %vm1749_vm5, %vm1750_vm4 }
 0x519   :  { %v1746_v33 = vsub.f32 1.0, %v1745_v0 }
 0x51b   :  { %v1747_v34 = vmul.f32 %v2213_v32, %v1746_v33  ;;  %v1743_v8 = vpop.xlane.xlu2 %1742 }
 0x51c   :  { %2214 = vrcp.f32 %v1743_v8  ;;  %v1770_v46 = vand.u32 2147483648, %v1743_v8  ;;  %v1768_v49 = vand.u32 2147483647, %v1743_v8  ;;  %vm1764_vm9 = vweird.f32 %v1743_v8 }
 0x51d   :  { %v1748_v35 = vadd.f32 %v2213_v32, %v1747_v34 }
 0x51e   :  { %v1771_v54 = vor.u32 1.1754944e-38, %v1770_v46  ;;  %vm1769_vm11 = vcmp.eq.f32.partialorder %v1768_v49, 8.507059e+37 }
 0x51f   :  { %v1752_v37 = vsel %vm1751_vm6, %v2213_v32, %v1748_v35 }
 0x520   :  { %v1757_v39 = vsel %vm1754_vm7, %v1756_v36, %v1752_v37 }
 0x521   :  { %v1758_v40 = vmul.f32 %v2209_v19, %v1757_v39 }
 0x522   :  { %v2215_v38 = vpop.eup %2214 }
 0x523   :  { %v1760_v41 = vmul.f32 %v2215_v38, %v1743_v8  ;;  %v1400_v42 = vpop.permute.xlu2 %1399  ;;  %v1779_v43 = vsel %vm376_vm1, %v1758_v40, 0  ;;  %vm1765_vm8 = vweird.f32 %v2215_v38  ;;  %v2333_v8 = vmov 48.0  }
 0x524   :  { %1406 = vst.msk [vmem:[#allocation2] sm:$0xff] %vm1405_vm0, %v1400_v42  ;;  %v1798_v44 = vand.u32 4294901760, %v1779_v43  ;;  %vm1766_vm10 = vmor %vm1764_vm9, %vm1765_vm8  ;;  %2216 = vrcp.f32 %v2333_v8 }
 0x525   :  { %v1761_v45 = vsub.f32 1.0, %v1760_v41 }
 0x526   :  { %1829 = vmatmul.f32.vlgmr.msrb.gmra.mxu1 %v1798_v44  ;;  %v1799_v47 = vsub.f32 %v1779_v43, %v1798_v44 }
 0x527   :  { %v1762_v48 = vmul.f32 %v2215_v38, %v1761_v45  ;;  %v1929_v50 = vpop.permute.xlu1 %1928 }
 0x528   :  { %v1949_v51 = vand.u32 4294901760, %v1929_v50  ;;  %1853 = vmatmul.f32.vlgmr.msrb.gmra.mxu2 %v1799_v47  ;;  %v1800_v52 = vand.u32 4294901760, %v1799_v47 }
 0x529   :  { %v1763_v53 = vadd.f32 %v2215_v38, %v1762_v48 }
 0x52a   :  { %v1976_v55 = vsub.f32 %v1929_v50, %v1949_v51  ;;  %1877 = vmatmul.f32.vlgmr.msrb.gmra.mxu3 %v1800_v52  ;;  %1950 = vmatpush.msra.mxu2 %v1949_v51  ;;  %v1801_v56 = vsub.f32 %v1799_v47, %v1800_v52  ;;  %v2217_v35 = vpop.eup %2216 }
 0x52b   :  { %v1767_v57 = vsel %vm1766_vm10, %v2215_v38, %v1763_v53  ;;  %2026 = vmatpush.msrb.mxu1 %v1949_v51  ;;  %v2101_v36 = vmul.f32 48.0, %v2217_v35  ;;  %vm2105_vm13 = vweird.f32 %v2217_v35 }
 0x52c   :  { %v1772_v58 = vsel %vm1769_vm11, %v1771_v54, %v1767_v57  ;;  %v1977_v59 = vand.u32 4294901760, %v1976_v55  ;;  %v1802_v61 = vand.u32 4294901760, %v1801_v56 }
 0x52d   :  { %v1773_v63 = vmul.f32 %v2480_v23, %v1772_v58  ;;  %v2102_v37 = vsub.f32 1.0, %v2101_v36 }
 0x52e   :  { %v1978_v3 = vsub.f32 %v1976_v55, %v1977_v59  ;;  %1803 = vmatmul.f32.vlgmr.msrb.gmra.mxu0 %v1802_v61  ;;  %1923 = vmatmul.f32.vlgmr.msra.gmra.mxu1 %v1798_v44 }
 0x52f   :  { %2003 = vmatpush.msrb.mxu0 %v1976_v55  ;;  %2052 = vmatpush.msrb.mxu2 %v1977_v59  ;;  %v1932_v4 = vsel %vm376_vm1, %v1773_v63, 0  ;;  %vm2088_vm1 = vcmask 392448   ;;  %v2103_v39 = vmul.f32 %v2217_v35, %v2102_v37 }
 0x530   :  { %v1979_v60 = vand.u32 4294901760, %v1978_v3  ;;  %v1951_v5 = vand.u32 4294901760, %v1932_v4  ;;  %v2190_v3 = vld [vmem:[%s2514_s3] ss:$0 sm:$0xff] }
 0x531   :  { %v2104_v40 = vadd.f32 %v2217_v35, %v2103_v39 }
 0x532   :  { %1980 = vmatpush.msra.mxu3 %v1979_v60  ;;  %v1952_v7 = vsub.f32 %v1932_v4, %v1951_v5 }
 0x533   :  { %1982 = vmatmul.f32.vlgmr.msra.gmra.mxu3 %v1951_v5  ;;  %v2106_v38 = vsel %vm2105_vm13, %v2217_v35, %v2104_v40 }
 0x534   :  { %2074 = vmatpush.msrb.mxu3 %v1949_v51  ;;  %v1953_v9 = vand.u32 4294901760, %v1952_v7 }
 0x536   :  { %1901 = vmatmul.f32.vlgmr.msra.gmra.mxu0 %v1798_v44  ;;  %2030 = vmatmul.f32.vlgmr.msrb.gmra.mxu1 %v1953_v9  ;;  %v1954_v10 = vsub.f32 %v1952_v7, %v1953_v9 }
 0x538   :  { %v1955_v11 = vand.u32 4294901760, %v1954_v10 }
 0x53a   :  { %1956 = vmatmul.f32.vlgmr.msra.gmra.mxu2 %v1955_v11 }
 0x53b   :  { %2076 = vmatmul.f32.vlgmr.msrb.gmra.mxu3 %v1951_v5 }
 0x53e   :  { %2006 = vmatmul.f32.vlgmr.msrb.gmra.mxu0 %v1952_v7  ;;  %v2191_v7 = vld [vmem:[%s2514_s3 + $0x1] ss:$0 sm:$0xff]  ;;  %s2165_s3 = sshll.u32 %s2515_s4, 4  ;;  %s2166_s3 = int_to_ptr.hbm [resolvable:$true] %s2165_s3 }
 0x542   :  { %2054 = vmatmul.f32.vlgmr.msrb.gmra.mxu2 %v1951_v5 }
 0x5a3   :  { %v1830_v12 = vpop.f32.mrf.mxu1 }
 0x5ab   :  { %v1804_v13 = vpop.f32.mrf.mxu0  ;;  %v1854_v15 = vpop.f32.mrf.mxu2 }
 0x5ac   :  { %v1831_v14 = vadd.f32 %v1830_v12, %v1804_v13  ;;  %v1924_v6 = vpop.f32.mrf.mxu1 }
 0x5ad   :  { %v1878_v17 = vpop.f32.mrf.mxu3 }
 0x5ae   :  { %v1855_v16 = vadd.f32 %v1854_v15, %v1831_v14 }
 0x5b0   :  { %v1879_v18 = vadd.f32 %v1878_v17, %v1855_v16 }
 0x5b3   :  { %v1902_v19 = vpop.f32.mrf.mxu0 }
 0x5b4   :  { %v1903_v20 = vadd.f32 %v1902_v19, %v1879_v18  ;;  %v2031_v26 = vpop.f32.mrf.mxu1 }
 0x5b6   :  { %v1925_v21 = vadd.f32 %v1924_v6, %v1903_v20  ;;  %v1983_v22 = vpop.f32.mrf.mxu3 }
 0x5b8   :  { %2082 = vrot.lane.b32.xlu1 %v1925_v21, %s2332_s6 }
 0x5bb   :  { %v2007_v24 = vpop.f32.mrf.mxu0 }
 0x5bd   :  { %v1957_v23 = vpop.f32.mrf.mxu2 }
 0x5be   :  { %v1984_v62 = vadd.f32 %v1983_v22, %v1957_v23  ;;  %v2077_v30 = vpop.f32.mrf.mxu3 }
 0x5c0   :  { %v2008_v25 = vadd.f32 %v2007_v24, %v1984_v62 }
 0x5c2   :  { %v2032_v27 = vadd.f32 %v2031_v26, %v2008_v25 }
 0x5c5   :  { %v2055_v28 = vpop.f32.mrf.mxu2 }
 0x5c6   :  { %v2056_v29 = vadd.f32 %v2055_v28, %v2032_v27 }
 0x5c8   :  { %v2078_v31 = vadd.f32 %v2077_v30, %v2056_v29 }
 0x5ca   :  { %2084 = vrot.lane.b32.xlu0 %v2078_v31, %s2332_s6 }
 0x62a   :  { %v2083_v32 = vpop.permute.xlu1 %2082 }
 0x62b   :  { %2089 = vst.msk [vmem:[#allocation2] sm:$0xff] %vm2088_vm1, %v2083_v32 }
 0x632   :  { %v2091_v0 = vld [vmem:[#allocation2] sm:$0xff] }
 0x633   :  { %v2094_v33 = vsel %vm2093_vm12, %v2091_v0, 0.0 }
 0x634   :  { %2095 = vadd.xlane.f32.xlu2 %v2094_v33 }
 0x63c   :  { %v2085_v1 = vpop.permute.xlu0 %2084 }
 0x63d   :  { %2090 = vst.msk [vmem:[#allocation2 + $0x8] sm:$0xff] %vm2088_vm1, %v2085_v1 }
 0x644   :  { %v2092_v34 = vld [vmem:[#allocation2 + $0x8] sm:$0xff] }
 0x645   :  { %v2097_v2 = vsel %vm2093_vm12, %v2092_v34, 0.0 }
 0x646   :  { %2098 = vadd.xlane.f32.xlu1 %v2097_v2 }
 0x6a7   :  { %v2096_v41 = vpop.xlane.xlu2 %2095 }
 0x6a8   :  { %v2107_v42 = vmul.f32 %v2106_v38, %v2096_v41 }
 0x6aa   :  { %v2109_v43 = vsub.f32 %v2091_v0, %v2107_v42 }
 0x6ac   :  { %v2111_v44 = vmul.f32 %v2109_v43, %v2109_v43 }
 0x6ae   :  { %v2113_v45 = vsel %vm2093_vm12, %v2111_v44, 0.0 }
 0x6af   :  { %2114 = vadd.xlane.f32.xlu0 %v2113_v45 }
 0x6b9   :  { %v2099_v46 = vpop.xlane.xlu1 %2098 }
 0x6ba   :  { %v2108_v47 = vmul.f32 %v2106_v38, %v2099_v46 }
 0x6bc   :  { %v2110_v48 = vsub.f32 %v2092_v34, %v2108_v47 }
 0x6be   :  { %v2112_v49 = vmul.f32 %v2110_v48, %v2110_v48 }
 0x6c0   :  { %v2116_v50 = vsel %vm2093_vm12, %v2112_v49, 0.0 }
 0x6c1   :  { %2117 = vadd.xlane.f32.xlu2 %v2116_v50 }
 0x722   :  { %v2115_v51 = vpop.xlane.xlu0 %2114 }
 0x723   :  { %v2119_v52 = vmul.f32 %v2115_v51, %v2106_v38 }
 0x725   :  { %v2121_v53 = vadd.f32 1e-05, %v2119_v52 }
 0x727   :  { %2218 = vrsqrt.f32 %v2121_v53  ;;  %vm2129_vm15 = vweird.f32 %v2121_v53 }
 0x72d   :  { %v2219_v54 = vpop.eup %2218 }
 0x72e   :  { %v2124_v55 = vmul.f32 %v2219_v54, %v2121_v53  ;;  %vm2130_vm14 = vweird.f32 %v2219_v54 }
 0x72f   :  { %vm2131_vm2 = vmor %vm2129_vm15, %vm2130_vm14 }
 0x730   :  { %v2125_v56 = vmul.f32 %v2219_v54, %v2124_v55 }
 0x732   :  { %v2126_v57 = vmul.f32 0.5, %v2125_v56 }
 0x734   :  { %v2127_v58 = vsub.f32 1.5, %v2126_v57  ;;  %v2118_v59 = vpop.xlane.xlu2 %2117 }
 0x735   :  { %v2120_v61 = vmul.f32 %v2118_v59, %v2106_v38 }
 0x736   :  { %v2128_v63 = vmul.f32 %v2219_v54, %v2127_v58 }
 0x737   :  { %v2122_v4 = vadd.f32 1e-05, %v2120_v61 }
 0x738   :  { %v2132_v60 = vsel %vm2131_vm2, %v2219_v54, %v2128_v63 }
 0x739   :  { %v2143_v5 = vmul.f32 %v2132_v60, %v2109_v43  ;;  %2220 = vrsqrt.f32 %v2122_v4  ;;  %vm2139_vm0 = vweird.f32 %v2122_v4 }
 0x73b   :  { %v2150_v9 = vmul.f32 %v2190_v3, %v2143_v5 }
 0x73d   :  { %v2155_v10 = vadd.f32 %v2191_v7, %v2150_v9 }
 0x73f   :  { %v2221_v11 = vpop.eup %2220  ;;  %2157 = vst.msk [vmem:[#allocation9] sm:$0xff] %vm2093_vm12, %v2155_v10 }
 0x740   :  { %v2134_v12 = vmul.f32 %v2221_v11, %v2122_v4  ;;  %vm2140_vm3 = vweird.f32 %v2221_v11 }
 0x741   :  { %vm2141_vm4 = vmor %vm2139_vm0, %vm2140_vm3 }
 0x742   :  { %v2135_v13 = vmul.f32 %v2221_v11, %v2134_v12 }
 0x744   :  { %v2136_v14 = vmul.f32 0.5, %v2135_v13 }
 0x746   :  { %v2137_v15 = vsub.f32 1.5, %v2136_v14 }
 0x748   :  { %v2138_v16 = vmul.f32 %v2221_v11, %v2137_v15 }
 0x74a   :  { %v2142_v17 = vsel %vm2141_vm4, %v2221_v11, %v2138_v16 }
 0x74b   :  { %v2144_v18 = vmul.f32 %v2142_v17, %v2110_v48 }
 0x74d   :  { %v2151_v19 = vmul.f32 %v2190_v3, %v2144_v18 }
 0x74f   :  { %v2156_v20 = vadd.f32 %v2191_v7, %v2151_v19 }
 0x751   :  { %2158 = vst.msk [vmem:[#allocation9 + $0x8] sm:$0xff] %vm2093_vm12, %v2156_v20 }
 0x752   :  { %2171 = dma.vmem_to_hbm [thread:$0]  %s2164_s12, 256, %s2166_s3, [#allocation5], %s2325_s23, %s2325_s23, %s2326_s24  }
 0x753   :  { %2322 = dma.done.wait [#allocation5], 256  }
 0x754   :  { %2323 = vsyncadd [#allocation5], 4294967040 }
 0x755   :  { %2176 = vsyncpa [#allocation4], 1 }
 0x756   :  { %2177 = vsyncpa [#allocation7], 1 }
 0x757   :  { %2178 = vsyncpa [#allocation5], 1 }

</bundles_post_ra>
